<compile_context>
chip_gen: v6e
topology: v6e:2x2x1
jax: 0.10.0
libtpu: 0.0.40
codegen_flags: <defaults>
</compile_context>

<pallas_src>
import jax
import jax.numpy as jnp
from jax import lax
from jax.experimental import pallas as pl
from jax.experimental.pallas import tpu as pltpu


# ----------------------------- Pallas kernel --------------------------------
def _conv_matmul_relu_kernel(p_ref, w_ref, b_ref, o_ref):
    # p_ref: (CKK, TM)  patches tile (compute dtype, e.g. bf16)
    # w_ref: (O, CKK)   full weight, resident (compute dtype)
    # b_ref: (O, 1)     bias, f32
    # o_ref: (O, TM)    output tile, f32 (lane dim = TM >= 128 -> dense stores)
    acc = jnp.dot(w_ref[...], p_ref[...], preferred_element_type=jnp.float32)
    acc = acc + b_ref[...]                                  # f32 bias broadcast
    o_ref[...] = jnp.maximum(acc, 0.0).astype(o_ref.dtype)  # ReLU, f32 epilogue


def _choose_tile_m(M, CKK, O, in_itemsize, *, target_tm=1024,
                   tile_budget_bytes=24 << 20):
    """Lane-tile size for the flattened spatial axis, sized against VMEM.

    Per-grid-step VMEM (double-buffered):
        2*tm*CKK*in_itemsize  (patches tile) + 2*tm*O*4 (f32 output tile)
      + 2*O*CKK*in_itemsize   (resident weight)
    The 24 MiB tile budget leaves headroom on v7x (64 MiB physical / 32 MiB
    scoped default); v5e's 16 MiB scoped default is raised via
    vmem_limit_bytes in the pallas_call.
    """
    per_col = 2 * (CKK * in_itemsize + O * 4)
    fixed = 2 * O * CKK * in_itemsize
    avail = max(tile_budget_bytes - fixed, 128 * per_col)
    tm = min(int(target_tm), int(avail // per_col))
    tm = max(128, (tm // 128) * 128)
    if M <= tm:
        return M        # single full-extent tile: always a legal block shape
    return tm


def _pallas_conv_matmul_relu(patches, w_mat, bias, *, target_tm=1024):
    """patches: (N, CKK, M), w_mat: (O, CKK), bias: (O,) -> (N, O, M) f32."""
    N, CKK, M = patches.shape
    O = w_mat.shape[0]
    itemsize = patches.dtype.itemsize

    tm = _choose_tile_m(M, CKK, O, itemsize, target_tm=target_tm)
    # No jnp.pad of M: cdiv grid, the boundary tile's stores are masked by Pallas.
    grid = (N, pl.cdiv(M, tm))

    bias2d = bias.reshape(O, 1).astype(jnp.float32)

    vmem_need = (2 * tm * (CKK * itemsize + O * 4)
                 + 2 * O * CKK * itemsize + (1 << 16))
    # Cap at 48 MiB so the request always fits v7x's 64 MiB physical VMEM.
    vmem_limit = int(min(max(2 * vmem_need, 32 << 20), 48 << 20))

    return pl.pallas_call(
        _conv_matmul_relu_kernel,
        out_shape=jax.ShapeDtypeStruct((N, O, M), jnp.float32),
        grid_spec=pltpu.PrefetchScalarGridSpec(
            num_scalar_prefetch=0,
            grid=grid,
            in_specs=[
                # patches tile: lane dim = tm (dense loads)
                pl.BlockSpec((None, CKK, tm), lambda n, j: (n, 0, j)),
                # full weight, same block index every step -> resident in VMEM
                pl.BlockSpec((O, CKK), lambda n, j: (0, 0)),
                pl.BlockSpec((O, 1), lambda n, j: (0, 0)),
            ],
            out_specs=pl.BlockSpec((None, O, tm), lambda n, j: (n, 0, j)),
        ),
        compiler_params=pltpu.CompilerParams(
            dimension_semantics=("parallel", "parallel"),
            vmem_limit_bytes=vmem_limit),
    )(patches, w_mat, bias2d)


# ------------------------------ JAX glue -------------------------------------
def _reflection_pad_nchw(x, pad):
    if pad == 0:
        return x
    return jnp.pad(x, ((0, 0), (0, 0), (pad, pad), (pad, pad)), mode="reflect")


def conv2d_block_forward(x, weight, bias, *, stride, padding,
                         compute_dtype=jnp.bfloat16, target_tm=1024):
    """Conv2dBlock.forward with norm='none', activation='relu', reflect pad.

    x:      (N, C, H, W)   NCHW
    weight: (O, C, K, K)   PyTorch Conv2d layout
    bias:   (O,)
    returns (N, O, Ho, Wo) float32 NCHW
    """
    N, C, H, W = x.shape
    O, _, K, _ = weight.shape

    xc = x.astype(compute_dtype)                     # halve HBM traffic downstream
    xp = _reflection_pad_nchw(xc, padding)           # ReflectionPad2d

    # Patch extraction as an XLA identity grouped-conv. Output channel ordering
    # is channel-major: feature index = c*K*K + kh*K + kw, which matches the
    # PyTorch weight.reshape(O, C*K*K) flattening, so no permutation is needed.
    # TODO(synk): fully fuse patch extraction into the kernel (halo DMA over the
    # padded input) to also remove the K^2 HBM footprint of `patches`.
    patches = lax.conv_general_dilated_patches(
        xp, filter_shape=(K, K), window_strides=(stride, stride),
        padding="VALID", dimension_numbers=("NCHW", "OIHW", "NCHW"))
    _, CKK, Ho, Wo = patches.shape
    patches = patches.reshape(N, CKK, Ho * Wo)       # lane dim = flattened spatial

    # Weight stays in its native (O, C*K*K) layout (no .T).
    # TODO(synk): for very large C*K*K / O, add a CKK reduction grid axis
    # ("arbitrary", last) with an f32 VMEM accumulator instead of keeping the
    # whole (O, C*K*K) weight resident.
    w_mat = weight.reshape(O, C * K * K).astype(compute_dtype)

    out = _pallas_conv_matmul_relu(patches, w_mat, bias, target_tm=target_tm)
    # (N, O, Ho*Wo) -> NCHW with a pure reshape; no transpose at all.
    return out.reshape(N, O, Ho, Wo)


# ------------------------------- main ----------------------------------------
if __name__ == "__main__":
    # Conv2dBlock(input_dim=4, output_dim=8, kernel_size=3, stride=1, padding=1,
    #             norm='none', activation='relu')
    N, C_in, H, W = 2, 4, 16, 16
    C_out, K, stride, padding = 8, 3, 1, 1

    key = jax.random.PRNGKey(0)
    kx, kw, kb = jax.random.split(key, 3)

    x = jax.random.normal(kx, (N, C_in, H, W), dtype=jnp.float32)
    weight = jax.random.normal(kw, (C_out, C_in, K, K), dtype=jnp.float32) * 0.1
    bias = jax.random.normal(kb, (C_out,), dtype=jnp.float32) * 0.1

    out = conv2d_block_forward(x, weight, bias, stride=stride, padding=padding)
    out = jax.block_until_ready(out)

    # Sanity check vs XLA's native conv on the SAME bf16-quantized inputs with
    # f32 accumulation, so the check validates the kernel (not the dtype choice).
    xb = _reflection_pad_nchw(x.astype(jnp.bfloat16), padding)
    wb = weight.astype(jnp.bfloat16)
    ref = lax.conv_general_dilated(
        xb, wb, window_strides=(stride, stride), padding="VALID",
        dimension_numbers=("NCHW", "OIHW", "NCHW"),
        preferred_element_type=jnp.float32)
    ref = jnp.maximum(ref + bias.reshape(1, C_out, 1, 1), 0.0)

    assert out.shape == (N, C_out, H, W), out.shape
    assert out.dtype == jnp.float32, out.dtype
    assert jnp.allclose(out, ref, atol=1e-3, rtol=1e-3), "mismatch vs reference"

    print("KERNEL_OK")
</pallas_src>

<mosaic_0001>
module attributes {stable_mosaic.version = 11 : i64} {
  func.func @_conv_matmul_relu_kernel(%arg0: i32, %arg1: i32, %arg2: memref<1x36x256xbf16, #tpu.memory_space<vmem>>, %arg3: memref<8x36xbf16, #tpu.memory_space<vmem>>, %arg4: memref<8x1xf32, #tpu.memory_space<vmem>>, %arg5: memref<1x8x256xf32, #tpu.memory_space<vmem>>) attributes {dimension_semantics = [#tpu.dimension_semantics<parallel>, #tpu.dimension_semantics<parallel>], iteration_bounds = array<i64: 2, 1>, scalar_prefetch = 0 : i64, scratch_operands = 0 : i64, tpu.core_type = #tpu.core_type<tc>, window_params = [{transform_indices = @transform_0, window_bounds = array<i64: 1, 36, 256>}, {pipeline_mode = #tpu.pipeline_mode<synchronous>, transform_indices = @transform_1, window_bounds = array<i64: 8, 36>}, {pipeline_mode = #tpu.pipeline_mode<synchronous>, transform_indices = @transform_2, window_bounds = array<i64: 8, 1>}, {transform_indices = @transform_3, window_bounds = array<i64: 1, 8, 256>}]} {
    %c0 = arith.constant 0 : index
    %c0_0 = arith.constant 0 : index
    %0 = vector.load %arg3[%c0, %c0_0] : memref<8x36xbf16, #tpu.memory_space<vmem>>, vector<8x36xbf16>
    %c0_1 = arith.constant 0 : index
    %c0_2 = arith.constant 0 : index
    %c0_3 = arith.constant 0 : index
    %1 = vector.load %arg2[%c0_1, %c0_2, %c0_3] : memref<1x36x256xbf16, #tpu.memory_space<vmem>>, vector<1x36x256xbf16>
    %2 = vector.shape_cast %1 : vector<1x36x256xbf16> to vector<36x256xbf16>
    %cst = arith.constant dense<0.000000e+00> : vector<8x256xf32>
    %3 = tpu.matmul %0, %2, %cst {dimension_numbers = #tpu.dot_dimension_numbers<[1], [0], [0], [1], [0, 0, 1, 1], [], []>} : vector<8x36xbf16>, vector<36x256xbf16>, vector<8x256xf32> -> vector<8x256xf32>
    %c0_4 = arith.constant 0 : index
    %c0_5 = arith.constant 0 : index
    %4 = vector.load %arg4[%c0_4, %c0_5] : memref<8x1xf32, #tpu.memory_space<vmem>>, vector<8x1xf32>
    %5 = vector.broadcast %4 : vector<8x1xf32> to vector<8x256xf32>
    %6 = arith.addf %3, %5 : vector<8x256xf32>
    %cst_6 = arith.constant 0.000000e+00 : f32
    %7 = vector.broadcast %cst_6 : f32 to vector<8x256xf32>
    %8 = arith.maximumf %6, %7 : vector<8x256xf32>
    %c0_7 = arith.constant 0 : index
    %c0_8 = arith.constant 0 : index
    %c0_9 = arith.constant 0 : index
    %9 = vector.load %arg5[%c0_7, %c0_8, %c0_9] : memref<1x8x256xf32, #tpu.memory_space<vmem>>, vector<1x8x256xf32>
    %10 = vector.shape_cast %9 : vector<1x8x256xf32> to vector<8x256xf32>
    %11 = vector.shape_cast %8 : vector<8x256xf32> to vector<1x8x256xf32>
    tpu.vector_store %arg5[%c0_7, %c0_8, %c0_9], %11 {strides = array<i32>} : memref<1x8x256xf32, #tpu.memory_space<vmem>>, vector<1x8x256xf32>,
    return
  }
  func.func @transform_0(%arg0: i32, %arg1: i32) -> (i32, i32, i32) {
    %c0_i32 = arith.constant 0 : i32
    %c0_i32_0 = arith.constant 0 : i32
    return %arg0, %c0_i32, %arg1 : i32, i32, i32
  }
  func.func @transform_1(%arg0: i32, %arg1: i32) -> (i32, i32) {
    %c0_i32 = arith.constant 0 : i32
    %c0_i32_0 = arith.constant 0 : i32
    %c0_i32_1 = arith.constant 0 : i32
    return %c0_i32, %c0_i32_0 : i32, i32
  }
  func.func @transform_2(%arg0: i32, %arg1: i32) -> (i32, i32) {
    %c0_i32 = arith.constant 0 : i32
    %c0_i32_0 = arith.constant 0 : i32
    %c0_i32_1 = arith.constant 0 : i32
    return %c0_i32, %c0_i32_0 : i32, i32
  }
  func.func @transform_3(%arg0: i32, %arg1: i32) -> (i32, i32, i32) {
    %c0_i32 = arith.constant 0 : i32
    %c0_i32_0 = arith.constant 0 : i32
    return %arg0, %c0_i32, %arg1 : i32, i32, i32
  }
}

</mosaic_0001>

<bundles_post_ra>
// kernel: tpu_custom_call.1
= control target key start
LH: loop header
LB: loop body
LE: loop exit
PB: predicated region body
PF: predicated region fallthrough
CT: control target
= control target key end

     0   :  { %8 = vsyncpa [#allocation3], 0  ;;  %s685_s0 = inlined_call_operand.vmem [shape: bf16[2,36,256], index: 0, kind: input, shape index: {}]   ;;  %s686_s1 = inlined_call_operand.vmem [shape: bf16[8,36], index: 1, kind: input, shape index: {}]   ;;  %s687_s2 = inlined_call_operand.vmem [shape: f32[8,1], index: 2, kind: input, shape index: {}]   ;;  %s688_s3 = inlined_call_operand.hbm [shape: f32[2,8,256], index: 3, kind: output, shape index: {}]  }
   0x1   :  { %10 = vsyncpa [#allocation3 + $0x1], 0  ;;  %s574_s12 = smov 0   ;;  %s576_s13 = smov 0  }
   0x2   :  { %s578_s14 = smov 0   ;;  %s580_s15 = smov 0  }
   0x3   :  { %s582_s16 = smov 0   ;;  %s584_s17 = smov 0  }
   0x4 LB: > { %s387_s18 = sadd.s32 4294967295, %s550_s17   ;;  %s388_s19 = sadd.s32 4294967294, %s550_s17   ;;  %s550_s17 = sphi %s584_s17, %s16_s17   ;;  %s546_s16 = sphi %s582_s16, %s695_s16   ;;  %s542_s15 = sphi %s580_s15, %s694_s15   ;;  %s538_s14 = sphi %s578_s14, %s693_s14   ;;  %s534_s13 = sphi %s576_s13, %s692_s13   ;;  %s530_s12 = sphi %s574_s12, %s691_s12  }
   0x5   : > { %s28_s20 = sadd.s32 1, %s546_s16  ;;  %s107_s21 = sadd.s32 1, %s538_s14 }
   0x6   : > { %p30_p0 = scmp.ge.s32.totalorder %s28_s20, 2  ;;  %p117_p1 = scmp.ne.s32.totalorder %s538_s14, %s534_s13 }
   0x7   : > { %p118_p2 = scmp.eq.s32.totalorder %s387_s18, 1  ;;  %p123_p3 = scmp.ne.s32.totalorder %s534_s13, %s530_s12 }
   0x8   : > { %s697_s20 = smov (%p30_p0, %s28_s20), 0  ;;  %p124_p5 = scmp.eq.s32.totalorder %s388_s19, 1 }
   0x9   : > { %p614_p4 = por %p118_p2, %p117_p1  ;;  %s102_s23 = ssub.s32 %s546_s16, %s697_s20 }
   0xa   : > { %p391_p6 = scmp.ge.s32.totalorder %s550_s17, 1  ;;  %p105_p7 = scmp.eq.s32.totalorder %s102_s23, 0 }
   0xb   : > { %p621_p8 = por %p124_p5, %p123_p3  ;;  %p161_p9 = scmp.lt.s32.totalorder %s550_s17, 3 }
   0xc   : > { %s627_s25 = scalar_select %p105_p7, %s538_s14, %s107_s21  }
   0xd   : > { %p162_p10 = pnand %p391_p6, %p161_p9 }
   0xe   : > { %p190_p11 = scmp.lt.s32.totalorder (!%p162_p10), %s542_s15, 1  ;;  %s186_s8 = sand.u32 (!%p162_p10), 1, %s534_s13  }
   0xf   : > { %165 = sbr.rel (%p162_p10) target bundleno = 252 (0xfc), region = 32  ;;  %s392_s9 = sshll.u32 (!%p162_p10), %s186_s8, 4 }
  0x10   : > { %s407_s10 = sshll.u32 (!%p162_p10), %s542_s15, 8  ;;  %s188_s11 = scalar_lea.vmem (!%p162_p10), [#allocation2], %s392_s9 }
  0x11   : > { %s311_s18 = sshll.u32 (!%p162_p10), %s188_s11, 4  ;;  %s645_s23 = scalar_lea.hbm (!%p162_p10), %s688_s3, %s407_s10  ;;  %s312_s18 = int_to_ptr.vmem [resolvable:$true] %s311_s18 }
  0x12   : > { %s295_s26 = scalar_lea.sflag (!%p162_p10), [#allocation3], %s186_s8  ;;  %s474_s27 = scalar_lea.vmem (!%p162_p10), %s312_s18, 256 }
  0x13   : > { %p475_p12 = scmp.ne.s32.totalorder (!%p162_p10), %s312_s18, %s474_s27 }
  0x14   : > { %v552_v0 = vmov 0   ;;  %v207_v1 = vld [vmem:[%s687_s2] sm:$0xff]  ;;  %s191_s28 = scalar_select %p190_p11, %s542_s15, 1  ;;  %vm242_vm0 = vcmask 1041408   ;;  %vm238_vm1 = vcmask 293888  }
  0x15   : > { %281 = vmatprep.mubr.bf16.mxu0 %v552_v0  ;;  %465 = vset.pattern.permute.xlu0 %v552_v0  ;;  %v201_v10 = vld [vmem:[%s686_s1] sm:$0xf]  ;;  %p476_p13 = pnand %p475_p12, %p614_p4  ;;  %s553_s15 = smov [#allocation2]  }
  0x16   : > { %210 = vperm.xlu0 %465, %v207_v1   ;;  %s408_s29 = smul.u32 40, %s191_s28  ;;  %s478_s28 = sshll.u32 %s553_s15, 4  ;;  %s479_s28 = int_to_ptr.vmem [resolvable:$false] %s478_s28 }
  0x17   : > { %p477_p0 = pneg %p476_p13  ;;  %p481_p1 = scmp.lt.s32.totalorder %s312_s18, %s479_s28 }
  0x18   : > { %s197_s5 = scalar_lea.vmem %s685_s0, %s408_s29  ;;  %s480_s29 = scalar_lea.vmem %s479_s28, 512 }
  0x19   : > { %v206_v2 = vld [vmem:[%s197_s5 + $0x20] sm:$0x33]  ;;  %v468_v5 = vld [vmem:[%s197_s5 + $0x14] ss:$8 sps:$4 sm:$0xff]   ;;  %v470_v7 = vld [vmem:[%s197_s5 + $0x10] ss:$8 sps:$4 sm:$0xff]   ;;  %p482_p2 = scmp.lt.s32.totalorder %s480_s29, %s474_s27 }
  0x1a   : > { %v399_v3 = vcombine.high %v206_v2, %v206_v2  ;;  %v398_v4 = vcombine.low %v206_v2, %v206_v2  ;;  %v471_v8 = vld [vmem:[%s197_s5 + $0x4] ss:$8 sps:$4 sm:$0xff]   ;;  %v473_v9 = vld [vmem:[%s197_s5] ss:$8 sps:$4 sm:$0xff]  }
  0x1b   : > { %p483_p3 = por %p482_p2, %p481_p1 }
  0x1c   : > { %400 = vmatprep.subr.msk.bf16.mxu0 %vm242_vm0, %v399_v3  ;;  %v244_v6 = vsel %vm242_vm0, %v398_v4, 0 }
  0x1d   : > { %260 = vmatpush1.bf16.msra.mxu0 %v244_v6  ;;  %p484_p5 = pnand %p483_p3, %p477_p0 }
  0x1e   : > { %261 = vmatprep.subr.bf16.mxu0 %v468_v5 }
  0x21   : > { %262 = vmatpush1.bf16.msra.mxu0 %v470_v7 }
  0x22   : > { %263 = vmatprep.subr.bf16.mxu0 %v471_v8 }
  0x25   : > { %264 = vmatpush1.bf16.msra.mxu0 %v473_v9 }
  0x28   : > { %401 = vmatmul.mubr.msk.bf16.vlgmr.msra.gmra.mxu0 %vm238_vm1, %v201_v10 }
  0x91   : > { %v211_v11 = vpop.permute.xlu0 %210 }
  0xe8   : > { %v283_v12 = vpop.f32.mrf.mxu0 }
  0xe9   : > { %v284_v13 = vadd.f32 %v283_v12, %v211_v11 }
  0xea   : > { %v285_v14 = vpop.f32.mrf.mxu0 }
  0xeb   : > { %v290_v15 = vmax.f32 %v284_v13, 0.0  ;;  %v286_v16 = vadd.f32 %v285_v14, %v211_v11 }
  0xec   : > { %v287_v17 = vpop.f32.mrf.mxu0 }
  0xed   : > { %292 = vst [vmem:[%s188_s11] sm:$0xff] %v290_v15  ;;  %v291_v18 = vmax.f32 %v286_v16, 0.0 }
  0xee   : > { %v288_v19 = vpop.f32.mrf.mxu0 }
  0xef   : > { %293 = vst [vmem:[%s188_s11 + $0x8] sm:$0xff] %v291_v18 }
  0xf0   : > { %487 = shalt.err (!%p484_p5)
}
  0xf1   : > { %s488_s30 = scalar_lea.hbm %s645_s23, 256  ;;  %s492_s6 = scalar_lea.hbm %s688_s3, 512 }
  0xf2   : > { %p489_p6 = scmp.ne.s32.totalorder %s645_s23, %s488_s30  ;;  %p493_p10 = scmp.lt.s32.totalorder %s645_s23, %s688_s3 }
  0xf3   : > { %p494_p11 = scmp.lt.s32.totalorder %s492_s6, %s488_s30 }
  0xf4   : > { %p490_p7 = pnand %p489_p6, %p614_p4 }
  0xf5   : > { %p495_p12 = por %p494_p11, %p493_p10 }
  0xf6   : > { %p491_p9 = pneg %p490_p7 }
  0xf8   : > { %p496_p13 = pnand %p495_p12, %p491_p9 }
  0xfa   : > { %499 = shalt.err (!%p496_p13)
}
  0xfb   : > { %409 = dma.vmem_to_hbm [thread:$0]  (%p614_p4), %s312_s18, 256, %s645_s23, %s295_s26  }
  0xfc PF: > { %p415_p0 = scmp.ge.s32.totalorder %s550_s17, 2  ;;  %s323_s9 = sand.u32 1, %s530_s12  }
  0xfd   : > { %s324_s10 = scalar_lea.sflag [#allocation3], %s323_s9 }
  0xfe   : > { %p412_p1 = pnand %p415_p0, %p621_p8 }
 0x100   : > { %p413_p2 = pneg %p412_p1 }
 0x102   : > { %525 = dma.done.wait (%p413_p2), %s324_s10, 256  }
 0x103   : > { %527 = vsyncadd (%p413_p2), %s324_s10, 4294967040  ;;  %s16_s17 = sadd.s32 1, %s550_s17   ;;  %s691_s12 = smov %s534_s13 }
 0x104   : > { %p13_p3 = scmp.ge.s32.totalorder %s16_s17, 4   ;;  %s692_s13 = smov %s538_s14 }
 0x105   : > { %s693_s14 = smov %s627_s25  ;;  %s694_s15 = smov %s546_s16 }
 0x106   : > { %s695_s16 = smov %s697_s20  ;;  %15 = sbr.rel (!%p13_p3) target bundleno = 4 (0x4), region = 67 }
 0x10b   :  { %329 = vsyncpa [#allocation3], 1 }
 0x10c   :  { %331 = vsyncpa [#allocation3 + $0x1], 1 }

</bundles_post_ra>
